<compile_context>
chip_gen: v6e
topology: v6e:2x2x1
jax: 0.10.0
libtpu: 0.0.40
codegen_flags: <defaults>
</compile_context>

<pallas_src>
import math

import jax
import jax.numpy as jnp
from jax.experimental import pallas as pl
from jax.experimental.pallas import tpu as pltpu


def _round_up(a, b):
    return (a + b - 1) // b * b


def _flatten_linear_kernel(x_ref, w_ref, o_ref, acc_ref):
    # Grid = (OUT tiles, K tiles); K is the trailing reduction axis.
    kk = pl.program_id(1)

    @pl.when(kk == 0)
    def _():
        acc_ref[...] = jnp.zeros_like(acc_ref)

    # x tile: (M, tk) bf16, w tile: (tn, tk) bf16  ->  (M, tn) f32 on the MXU.
    # Contract dim 1 of both operands: no transposed weight copy is ever made.
    acc_ref[...] += jax.lax.dot_general(
        x_ref[...],
        w_ref[...],
        dimension_numbers=(((1,), (1,)), ((), ())),
        preferred_element_type=jnp.float32,
    )

    @pl.when(kk == pl.num_programs(1) - 1)
    def _():
        o_ref[...] = acc_ref[...].astype(o_ref.dtype)


def flatten_unit_forward(x, weight, *, tk=512, tn=256,
                         compute_dtype=jnp.bfloat16):
    """y = x.reshape(N, -1) @ weight.T

    x:      (N, C, H, W)  (any leading-batch NCHW-style layout)
    weight: (out_features, in_features) with in_features == prod(x.shape[1:])
    """
    n = x.shape[0]
    k = math.prod(x.shape[1:])
    out_features = weight.shape[0]
    assert weight.shape[1] == k, (weight.shape, k)

    out_dtype = x.dtype

    # Row-major flatten (matches torch .view(N, -1) on contiguous tensors).
    x_flat = x.reshape(n, k)

    # Stream both operands in bf16 (f32 accumulation happens in-kernel).
    # In production the weight should already live in bf16 so this cast is free.
    x_flat = x_flat.astype(compute_dtype)
    w = weight.astype(compute_dtype)  # kept (OUT, K): no materialized transpose

    # Pad for (8, 128)-friendly, lane-dense tiles.
    m_pad = _round_up(max(n, 1), 8)
    tn_eff = min(tn, _round_up(out_features, 128))
    tk_eff = min(tk, _round_up(k, 128))
    k_pad = _round_up(k, tk_eff)
    out_pad = _round_up(out_features, tn_eff)

    if (m_pad, k_pad) != (n, k):
        x_flat = jnp.pad(x_flat, ((0, m_pad - n), (0, k_pad - k)))
    if (out_pad, k_pad) != (out_features, k):
        w = jnp.pad(w, ((0, out_pad - out_features), (0, k_pad - k)))

    grid = (out_pad // tn_eff, k_pad // tk_eff)

    y_pad = pl.pallas_call(
        _flatten_linear_kernel,
        out_shape=jax.ShapeDtypeStruct((m_pad, out_pad), out_dtype),
        grid_spec=pltpu.PrefetchScalarGridSpec(
            num_scalar_prefetch=0,
            grid=grid,
            in_specs=[
                # x: full (padded) batch, K-tile kk.
                pl.BlockSpec((m_pad, tk_eff), lambda j, kk: (0, kk)),
                # weight: OUT-tile j, K-tile kk (native (OUT, K) layout).
                pl.BlockSpec((tn_eff, tk_eff), lambda j, kk: (j, kk)),
            ],
            # Output block depends only on j -> resident across the K reduction.
            out_specs=pl.BlockSpec((m_pad, tn_eff), lambda j, kk: (0, j)),
            scratch_shapes=[pltpu.VMEM((m_pad, tn_eff), jnp.float32)],
        ),
        compiler_params=pltpu.CompilerParams(
            dimension_semantics=("parallel", "arbitrary"),
        ),
    )(x_flat, w)

    # Slice off the M / OUT padding.
    return y_pad[:n, :out_features]


if __name__ == "__main__":
    key = jax.random.PRNGKey(0)
    k_x, k_w = jax.random.split(key)

    # Small shapes consistent with the module: NCHW input, out_channels=32.
    N, C, H, W = 2, 4, 16, 16
    out_channels = 32
    in_features = C * H * W

    x = jax.random.normal(k_x, (N, C, H, W), dtype=jnp.float32)

    # Deterministic weight init mimicking nn.Linear default (bound = 1/sqrt(K)).
    bound = 1.0 / math.sqrt(in_features)
    weight = jax.random.uniform(
        k_w, (out_channels, in_features), dtype=jnp.float32,
        minval=-bound, maxval=bound,
    )

    y = flatten_unit_forward(x, weight)
    jax.block_until_ready(y)

    # Reference with the same bf16 operand precision and f32 accumulation.
    y_ref = jax.lax.dot_general(
        x.reshape(N, -1).astype(jnp.bfloat16),
        weight.astype(jnp.bfloat16),
        dimension_numbers=(((1,), (1,)), ((), ())),
        preferred_element_type=jnp.float32,
    ).astype(x.dtype)

    assert y.shape == (N, out_channels)
    assert jnp.allclose(y, y_ref, atol=2e-2, rtol=2e-2), (
        float(jnp.max(jnp.abs(y - y_ref))))

    print("KERNEL_OK")
</pallas_src>

<mosaic_0001>
module attributes {stable_mosaic.version = 11 : i64} {
  func.func @_flatten_linear_kernel(%arg0: i32, %arg1: i32, %arg2: memref<8x512xbf16, #tpu.memory_space<vmem>>, %arg3: memref<128x512xbf16, #tpu.memory_space<vmem>>, %arg4: memref<8x128xf32, #tpu.memory_space<vmem>>, %arg5: memref<8x128xf32, #tpu.memory_space<vmem>>) attributes {dimension_semantics = [#tpu.dimension_semantics<parallel>, #tpu.dimension_semantics<arbitrary>], iteration_bounds = array<i64: 1, 2>, scalar_prefetch = 0 : i64, scratch_operands = 1 : i64, tpu.core_type = #tpu.core_type<tc>, window_params = [{transform_indices = @transform_0, window_bounds = array<i64: 8, 512>}, {transform_indices = @transform_1, window_bounds = array<i64: 128, 512>}, {transform_indices = @transform_2, window_bounds = array<i64: 8, 128>}]} {
    %c0_i32 = arith.constant 0 : i32
    %0 = arith.cmpi eq, %arg1, %c0_i32 : i32
    %1 = arith.extui %0 : i1 to i32
    %c0_i32_0 = arith.constant 0 : i32
    %2 = arith.cmpi ne, %1, %c0_i32_0 : i32
    scf.if %2 {
      %cst_9 = arith.constant 0.000000e+00 : f32
      %12 = vector.broadcast %cst_9 : f32 to vector<8x128xf32>
      %c0_10 = arith.constant 0 : index
      %c0_11 = arith.constant 0 : index
      %13 = vector.load %arg5[%c0_10, %c0_11] : memref<8x128xf32, #tpu.memory_space<vmem>>, vector<8x128xf32>
      tpu.vector_store %arg5[%c0_10, %c0_11], %12 {strides = array<i32>} : memref<8x128xf32, #tpu.memory_space<vmem>>, vector<8x128xf32>,
    } else {
    }
    %c0 = arith.constant 0 : index
    %c0_1 = arith.constant 0 : index
    %3 = vector.load %arg5[%c0, %c0_1] : memref<8x128xf32, #tpu.memory_space<vmem>>, vector<8x128xf32>
    %c0_2 = arith.constant 0 : index
    %c0_3 = arith.constant 0 : index
    %4 = vector.load %arg2[%c0_2, %c0_3] : memref<8x512xbf16, #tpu.memory_space<vmem>>, vector<8x512xbf16>
    %c0_4 = arith.constant 0 : index
    %c0_5 = arith.constant 0 : index
    %5 = vector.load %arg3[%c0_4, %c0_5] : memref<128x512xbf16, #tpu.memory_space<vmem>>, vector<128x512xbf16>
    %cst = arith.constant dense<0.000000e+00> : vector<8x128xf32>
    %6 = tpu.matmul %4, %5, %cst {dimension_numbers = #tpu.dot_dimension_numbers<[1], [1], [0], [0], [0, 0, 1, 0], [], []>} : vector<8x512xbf16>, vector<128x512xbf16>, vector<8x128xf32> -> vector<8x128xf32>
    %7 = arith.addf %3, %6 : vector<8x128xf32>
    %c0_6 = arith.constant 0 : index
    %c0_7 = arith.constant 0 : index
    %8 = vector.load %arg5[%c0_6, %c0_7] : memref<8x128xf32, #tpu.memory_space<vmem>>, vector<8x128xf32>
    tpu.vector_store %arg5[%c0_6, %c0_7], %7 {strides = array<i32>} : memref<8x128xf32, #tpu.memory_space<vmem>>, vector<8x128xf32>,
    %c1_i32 = arith.constant 1 : i32
    %9 = arith.cmpi eq, %arg1, %c1_i32 : i32
    %10 = arith.extui %9 : i1 to i32
    %c0_i32_8 = arith.constant 0 : i32
    %11 = arith.cmpi ne, %10, %c0_i32_8 : i32
    scf.if %11 {
      %c0_9 = arith.constant 0 : index
      %c0_10 = arith.constant 0 : index
      %12 = vector.load %arg5[%c0_9, %c0_10] : memref<8x128xf32, #tpu.memory_space<vmem>>, vector<8x128xf32>
      %c0_11 = arith.constant 0 : index
      %c0_12 = arith.constant 0 : index
      %13 = vector.load %arg4[%c0_11, %c0_12] : memref<8x128xf32, #tpu.memory_space<vmem>>, vector<8x128xf32>
      tpu.vector_store %arg4[%c0_11, %c0_12], %12 {strides = array<i32>} : memref<8x128xf32, #tpu.memory_space<vmem>>, vector<8x128xf32>,
    } else {
    }
    return
  }
  func.func @transform_0(%arg0: i32, %arg1: i32) -> (i32, i32) {
    %c0_i32 = arith.constant 0 : i32
    %c0_i32_0 = arith.constant 0 : i32
    return %c0_i32, %arg1 : i32, i32
  }
  func.func @transform_1(%arg0: i32, %arg1: i32) -> (i32, i32) {
    %c0_i32 = arith.constant 0 : i32
    return %arg0, %arg1 : i32, i32
  }
  func.func @transform_2(%arg0: i32, %arg1: i32) -> (i32, i32) {
    %c0_i32 = arith.constant 0 : i32
    %c0_i32_0 = arith.constant 0 : i32
    return %c0_i32, %arg0 : i32, i32
  }
}

</mosaic_0001>

<bundles_post_ra>
// kernel: tpu_custom_call.1
= control target key start
LH: loop header
LB: loop body
LE: loop exit
PB: predicated region body
PF: predicated region fallthrough
CT: control target
= control target key end

     0   :  { %7 = vsyncpa [#allocation4], 0  ;;  %s1130_s0 = inlined_call_operand.hbm [shape: bf16[8,1024], index: 0, kind: input, shape index: {}]   ;;  %s1131_s1 = inlined_call_operand.hbm [shape: bf16[128,1024], index: 1, kind: input, shape index: {}]   ;;  %s1132_s2 = inlined_call_operand.hbm [shape: f32[8,128], index: 2, kind: output, shape index: {}]  }
   0x1   :  { %9 = vsyncpa [#allocation4 + $0x1], 0 }
   0x2   :  { %10 = vsyncpa [#allocation7], 0 }
   0x3   :  { %12 = vsyncpa [#allocation7 + $0x1], 0 }
   0x4   :  { %13 = vsyncpa [#allocation5], 0  ;;  %s953_s9 = smov 0   ;;  %s955_s10 = smov 0  }
   0x5   :  { %s957_s11 = smov 0   ;;  %s959_s12 = smov 0  }
   0x6   :  { %s961_s13 = smov 0   ;;  %s963_s14 = smov 0  }
   0x7 LB: > { %s612_s15 = sadd.s32 4294967295, %s929_s14   ;;  %s28_s16 = sadd.s32 1, %s925_s13  ;;  %s929_s14 = sphi %s963_s14, %s19_s14   ;;  %s925_s13 = sphi %s961_s13, %s1142_s13   ;;  %s921_s12 = sphi %s959_s12, %s1141_s12   ;;  %s917_s11 = sphi %s957_s11, %s1140_s11   ;;  %s913_s10 = sphi %s955_s10, %s1139_s10   ;;  %s909_s9 = sphi %s953_s9, %s1138_s9  }
   0x8   : > { %p29_p0 = scmp.ge.s32.totalorder %s28_s16, 2  ;;  %s38_s17 = sadd.s32 1, %s917_s11 }
   0x9   : > { %p45_p1 = scmp.ne.s32.totalorder %s917_s11, %s913_s10  ;;  %p46_p2 = scmp.eq.s32.totalorder %s929_s14, 0 }
   0xa   : > { %s1144_s16 = smov (%p29_p0, %s28_s16), 0  ;;  %p51_p4 = scmp.ne.s32.totalorder %s913_s10, %s909_s9 }
   0xb   : > { %p989_p3 = por %p46_p2, %p45_p1  ;;  %s35_s19 = ssub.s32 %s925_s13, %s1144_s16 }
   0xc   : > { %p52_p5 = scmp.eq.s32.totalorder %s612_s15, 0  ;;  %p36_p6 = scmp.eq.s32.totalorder %s35_s19, 0 }
   0xd   : > { %p683_p8 = scmp.lt.s32.totalorder %s929_s14, 2  ;;  %s1007_s22 = sand.u32 1, %s917_s11  }
   0xe   : > { %p998_p7 = por %p52_p5, %p51_p4  ;;  %s666_s23 = sshll.u32 %s925_s13, 8 }
   0xf   : > { %s1004_s21 = scalar_select %p36_p6, %s917_s11, %s38_s17  }
  0x10   : > { %s615_s24 = sshll.u32 %s1007_s22, 4  ;;  %s139_s27 = scalar_lea.hbm %s1130_s0, %s666_s23 }
  0x11   : > { %s133_s28 = scalar_lea.vmem [#allocation3], %s615_s24  ;;  %p1016_p9 = pnand %p683_p8, %p989_p3 }
  0x12   : > { %s141_s29 = sshll.u32 %s133_s28, 4  ;;  %s618_s3 = sshll.u32 %s1007_s22, 8  ;;  %s142_s29 = int_to_ptr.vmem [resolvable:$true] %s141_s29 }
  0x13   : > { %s130_s4 = scalar_lea.sflag [#allocation4], %s1007_s22  ;;  %p793_p10 = pneg %p1016_p9 }
  0x14   : > { %s804_s5 = scalar_lea.vmem %s142_s29, 256  ;;  %s931_s6 = smov [#allocation3]  }
  0x15   : > { %p805_p11 = scmp.ne.s32.totalorder %s142_s29, %s804_s5  ;;  %s809_s7 = sshll.u32 %s931_s6, 4  ;;  %s810_s7 = int_to_ptr.vmem [resolvable:$false] %s809_s7 }
  0x16   : > { %s811_s8 = scalar_lea.vmem %s810_s7, 512  ;;  %p812_p0 = scmp.lt.s32.totalorder %s142_s29, %s810_s7 }
  0x17   : > { %p807_p12 = pnand %p805_p11, %p793_p10  ;;  %p813_p1 = scmp.lt.s32.totalorder %s811_s8, %s804_s5 }
  0x19   : > { %p808_p13 = pneg %p807_p12  ;;  %p814_p2 = por %p813_p1, %p812_p0 }
  0x1b   : > { %p815_p3 = pnand %p814_p2, %p808_p13 }
  0x1d   : > { %818 = shalt.err (!%p815_p3)
}
  0x1e   : > { %679 = dma.hbm_to_vmem [thread:$0]  (!%p1016_p9), %s139_s27, 256, %s142_s29, %s130_s4  }
  0x1f   : > { %s161_s18 = scalar_lea.hbm %s1131_s1, %s666_s23  ;;  %p621_p4 = scmp.ge.s32.totalorder %s929_s14, 1 }
  0x20   : > { %p170_p5 = scmp.lt.s32.totalorder %s929_s14, 3  ;;  %s152_s19 = scalar_lea.vmem [#allocation6], %s618_s3 }
  0x21   : > { %s162_s24 = sshll.u32 %s152_s19, 4  ;;  %s149_s26 = scalar_lea.sflag [#allocation7], %s1007_s22  ;;  %s163_s24 = int_to_ptr.vmem [resolvable:$true] %s162_s24 }
  0x22   : > { %p1034_p6 = pnand %p621_p4, %p170_p5  ;;  %s832_s28 = scalar_lea.vmem %s163_s24, 4096 }
  0x23   : > { %p833_p8 = scmp.ne.s32.totalorder %s163_s24, %s832_s28  ;;  %s932_s27 = smov [#allocation6]  }
  0x24   : > { %s837_s29 = sshll.u32 %s932_s27, 4  ;;  %s838_s29 = int_to_ptr.vmem [resolvable:$false] %s837_s29 }
  0x25   : > { %p835_p11 = pnand %p833_p8, %p793_p10  ;;  %s839_s23 = scalar_lea.vmem %s838_s29, 8192 }
  0x26   : > { %p840_p13 = scmp.lt.s32.totalorder %s163_s24, %s838_s29  ;;  %p841_p0 = scmp.lt.s32.totalorder %s839_s23, %s832_s28 }
  0x27   : > { %p836_p12 = pneg %p835_p11 }
  0x28   : > { %p842_p1 = por %p841_p0, %p840_p13 }
  0x2a   : > { %p843_p2 = pnand %p842_p1, %p836_p12 }
  0x2c   : > { %846 = shalt.err (!%p843_p2)
}
  0x2d   : > { %s933_s3 = smov 512   ;;  %s934_s4 = smov 256  }
  0x2e   : > { %s935_s5 = smov 16   ;;  %174 = sbr.rel (%p1034_p6) target bundleno = 350 (0x15e), region = 28 }
  0x2f   : > { %682 = dma.hbm_to_vmem [thread:$0]  (!%p1016_p9), %s161_s18, 4096, %s163_s24, %s149_s26, %s933_s3, %s934_s4, %s935_s5  }
  0x30   : > { %s176_s22 = sand.u32 (!%p1034_p6), 1, %s913_s10  }
  0x31   : > { %s622_s6 = sshll.u32 (!%p1034_p6), %s176_s22, 4  ;;  %s177_s7 = scalar_lea.sflag (!%p1034_p6), [#allocation4], %s176_s22 }
  0x32   : > { %s1047_s8 = scalar_lea.vmem (!%p1034_p6), [#allocation3], %s622_s6 }
  0x33   : > { %896 = dma.done.wait (%p998_p7), %s177_s7, 256  }
  0x34   : > { %898 = vsyncadd (%p998_p7), %s177_s7, 4294967040  ;;  %s623_s9 = sshll.u32 %s176_s22, 8  ;;  %s186_s17 = scalar_lea.sflag [#allocation7], %s176_s22 }
  0x35   : > { %s1053_s30 = scalar_lea.vmem [#allocation6], %s623_s9 }
  0x36   : > { %900 = dma.done.wait (%p998_p7), %s186_s17, 4096  }
  0x37   : > { %902 = vsyncadd (%p998_p7), %s186_s17, 4294963200  ;;  %p624_p9 = scmp.ne.s32.totalorder %s921_s12, 0 }
  0x39   : > { %217 = sbr.rel (%p624_p9) target bundleno = 64 (0x40), region = 40 }
  0x3e   : > { %v936_v0 = vmov 0.0  }
  0x3f   : > { %218 = vst [vmem:[#allocation2] sm:$0xff] %v936_v0 }
  0x40 PF: > { %v739_v1 = vld [vmem:[%s1053_s30 + $0xe4] ss:$16 sps:$4 sm:$0xff]   ;;  %v741_v2 = vld [vmem:[%s1053_s30 + $0xec] ss:$16 sps:$4 sm:$0xff]   ;;  %v743_v3 = vld [vmem:[%s1053_s30 + $0xe0] ss:$16 sps:$4 sm:$0xff]  }
  0x41   : > { %428 = vmatprep.subr.bf16.mxu0 %v739_v1  ;;  %v744_v4 = vld [vmem:[%s1053_s30 + $0xe8] ss:$16 sps:$4 sm:$0xff]   ;;  %468 = vmatprep.subr.bf16.mxu1 %v741_v2  ;;  %v745_v5 = vld [vmem:[%s1053_s30 + $0xc4] ss:$16 sps:$4 sm:$0xff]   ;;  %v747_v6 = vld [vmem:[%s1053_s30 + $0xcc] ss:$16 sps:$4 sm:$0xff]  }
  0x42   : > { %429 = vmatpush1.bf16.xpose.msra.mxu0 %v743_v3  ;;  %469 = vmatpush1.bf16.xpose.msra.mxu1 %v744_v4  ;;  %v749_v7 = vld [vmem:[%s1053_s30 + $0xc0] ss:$16 sps:$4 sm:$0xff]   ;;  %v750_v8 = vld [vmem:[%s1053_s30 + $0xc8] ss:$16 sps:$4 sm:$0xff]   ;;  %v751_v9 = vld [vmem:[%s1053_s30 + $0xa4] ss:$16 sps:$4 sm:$0xff]  }
  0x43   : > { %430 = vmatprep.subr.bf16.mxu0 %v745_v5  ;;  %470 = vmatprep.subr.bf16.mxu1 %v747_v6  ;;  %v753_v10 = vld [vmem:[%s1053_s30 + $0xac] ss:$16 sps:$4 sm:$0xff]   ;;  %v755_v11 = vld [vmem:[%s1053_s30 + $0xa0] ss:$16 sps:$4 sm:$0xff]   ;;  %v756_v12 = vld [vmem:[%s1053_s30 + $0xa8] ss:$16 sps:$4 sm:$0xff]  }
  0x44   : > { %v757_v13 = vld [vmem:[%s1053_s30 + $0x84] ss:$16 sps:$4 sm:$0xff]   ;;  %v759_v14 = vld [vmem:[%s1053_s30 + $0x8c] ss:$16 sps:$4 sm:$0xff]   ;;  %v761_v19 = vld [vmem:[%s1053_s30 + $0x80] ss:$16 sps:$4 sm:$0xff]  }
  0x45   : > { %v220_v15 = vld [vmem:[%s1047_s8] sm:$0xff]  ;;  %v221_v16 = vld [vmem:[%s1047_s8 + $0x8] sm:$0xff]  ;;  %p661_p7 = scmp.ne.s32.totalorder %s921_s12, 1 }
  0x46   : > { %v626_v17 = vcombine.high %v220_v15, %v220_v15  ;;  %v628_v18 = vcombine.high %v221_v16, %v221_v16  ;;  %v762_v20 = vld [vmem:[%s1053_s30 + $0x88] ss:$16 sps:$4 sm:$0xff]   ;;  %v763_v21 = vld [vmem:[%s1053_s30 + $0x64] ss:$16 sps:$4 sm:$0xff]   ;;  %v765_v22 = vld [vmem:[%s1053_s30 + $0x6c] ss:$16 sps:$4 sm:$0xff]   ;;  %v625_v37 = vcombine.low %v220_v15, %v220_v15  ;;  %v627_v38 = vcombine.low %v221_v16, %v221_v16 }
  0x47   : > { %v767_v23 = vld [vmem:[%s1053_s30 + $0x60] ss:$16 sps:$4 sm:$0xff]   ;;  %v768_v24 = vld [vmem:[%s1053_s30 + $0x68] ss:$16 sps:$4 sm:$0xff]   ;;  %v769_v25 = vld [vmem:[%s1053_s30 + $0x44] ss:$16 sps:$4 sm:$0xff]  }
  0x48   : > { %460 = vmatprep.mubr.bf16.mxu0 %v626_v17  ;;  %500 = vmatprep.mubr.bf16.mxu1 %v628_v18  ;;  %v771_v26 = vld [vmem:[%s1053_s30 + $0x4c] ss:$16 sps:$4 sm:$0xff]   ;;  %v773_v27 = vld [vmem:[%s1053_s30 + $0x40] ss:$16 sps:$4 sm:$0xff]   ;;  %v774_v28 = vld [vmem:[%s1053_s30 + $0x48] ss:$16 sps:$4 sm:$0xff]  }
  0x49   : > { %v775_v29 = vld [vmem:[%s1053_s30 + $0x24] ss:$16 sps:$4 sm:$0xff]   ;;  %v777_v30 = vld [vmem:[%s1053_s30 + $0x2c] ss:$16 sps:$4 sm:$0xff]   ;;  %v779_v31 = vld [vmem:[%s1053_s30 + $0x20] ss:$16 sps:$4 sm:$0xff]  }
  0x4a   : > { %431 = vmatpush1.bf16.xpose.msra.mxu0 %v749_v7  ;;  %471 = vmatpush1.bf16.xpose.msra.mxu1 %v750_v8  ;;  %v780_v32 = vld [vmem:[%s1053_s30 + $0x28] ss:$16 sps:$4 sm:$0xff]   ;;  %v781_v33 = vld [vmem:[%s1053_s30 + $0x4] ss:$16 sps:$4 sm:$0xff]   ;;  %v783_v34 = vld [vmem:[%s1053_s30 + $0xc] ss:$16 sps:$4 sm:$0xff]  }
  0x4b   : > { %432 = vmatprep.subr.bf16.mxu0 %v751_v9  ;;  %472 = vmatprep.subr.bf16.mxu1 %v753_v10  ;;  %v785_v35 = vld [vmem:[%s1053_s30] ss:$16 sps:$4 sm:$0xff]   ;;  %v786_v36 = vld [vmem:[%s1053_s30 + $0x8] ss:$16 sps:$4 sm:$0xff]  }
  0x4c   : > { %v219_v40 = vld [vmem:[#allocation2] sm:$0xff] }
  0x52   : > { %433 = vmatpush1.bf16.xpose.msra.mxu0 %v755_v11  ;;  %473 = vmatpush1.bf16.xpose.msra.mxu1 %v756_v12 }
  0x53   : > { %434 = vmatprep.subr.bf16.mxu0 %v757_v13  ;;  %474 = vmatprep.subr.bf16.mxu1 %v759_v14 }
  0x5a   : > { %435 = vmatpush1.bf16.xpose.msra.mxu0 %v761_v19  ;;  %475 = vmatpush1.bf16.xpose.msra.mxu1 %v762_v20 }
  0x5b   : > { %436 = vmatprep.subr.bf16.mxu0 %v763_v21  ;;  %476 = vmatprep.subr.bf16.mxu1 %v765_v22 }
  0x62   : > { %437 = vmatpush1.bf16.xpose.msra.mxu0 %v767_v23  ;;  %477 = vmatpush1.bf16.xpose.msra.mxu1 %v768_v24 }
  0x63   : > { %438 = vmatprep.subr.bf16.mxu0 %v769_v25  ;;  %478 = vmatprep.subr.bf16.mxu1 %v771_v26 }
  0x6a   : > { %439 = vmatpush1.bf16.xpose.msra.mxu0 %v773_v27  ;;  %479 = vmatpush1.bf16.xpose.msra.mxu1 %v774_v28 }
  0x6b   : > { %440 = vmatprep.subr.bf16.mxu0 %v775_v29  ;;  %480 = vmatprep.subr.bf16.mxu1 %v777_v30 }
  0x72   : > { %441 = vmatpush1.bf16.xpose.msra.mxu0 %v779_v31  ;;  %481 = vmatpush1.bf16.xpose.msra.mxu1 %v780_v32 }
  0x73   : > { %442 = vmatprep.subr.bf16.mxu0 %v781_v33  ;;  %482 = vmatprep.subr.bf16.mxu1 %v783_v34 }
  0x7a   : > { %443 = vmatpush1.bf16.xpose.msra.mxu0 %v785_v35  ;;  %483 = vmatpush1.bf16.xpose.msra.mxu1 %v786_v36 }
  0x81   : > { %461 = vmatmul.mubr.bf16.vlgmr.msra.gmra.mxu0 %v625_v37  ;;  %501 = vmatmul.mubr.bf16.vlgmr.msra.gmra.mxu1 %v627_v38 }
 0x141   : > { %v462_v39 = vpop.f32.mrf.mxu0  ;;  %v502_v41 = vpop.f32.mrf.mxu1 }
 0x142   : > { %v503_v42 = vadd.f32 %v502_v41, %v462_v39 }
 0x143   : > { %v464_v43 = vpop.f32.mrf.mxu0  ;;  %v504_v44 = vpop.f32.mrf.mxu1  ;;  %513 = sbr.rel (%p661_p7) target bundleno = 335 (0x14f), region = 44 }
 0x144   : > { %v508_v45 = vadd.f32 %v503_v42, %v219_v40 }
 0x145   : > { %v465_v46 = vpop.f32.mrf.mxu0  ;;  %v505_v47 = vpop.f32.mrf.mxu1 }
 0x146   : > { %509 = vst [vmem:[#allocation2] sm:$0xff] %v508_v45 }
 0x147   : > { %v466_v48 = vpop.f32.mrf.mxu0  ;;  %v506_v49 = vpop.f32.mrf.mxu1 }
 0x14d   : > { %v514_v50 = vld [vmem:[#allocation2] sm:$0xff] }
 0x14e   : > { %515 = vst [vmem:[#allocation8] sm:$0xff] %v514_v50 }
 0x14f PF: > { %p1097_p10 = scmp.eq.s32.totalorder %s612_s15, 1  ;;  %s937_s18 = smov [#allocation8]  }
 0x150   : > { %s525_s19 = sshll.u32 %s937_s18, 4  ;;  %s526_s19 = int_to_ptr.vmem [resolvable:$true] %s525_s19 }
 0x151   : > { %s847_s24 = scalar_lea.vmem %s526_s19, 128  ;;  %p854_p6 = scmp.lt.s32.totalorder %s526_s19, %s526_s19 }
 0x152   : > { %p848_p3 = scmp.ne.s32.totalorder %s526_s19, %s847_s24  ;;  %p855_p8 = scmp.lt.s32.totalorder %s847_s24, %s847_s24 }
 0x154   : > { %p849_p4 = pnand %p848_p3, %p1097_p10  ;;  %p856_p11 = por %p855_p8, %p854_p6 }
 0x156   : > { %p850_p5 = pneg %p849_p4 }
 0x158   : > { %p857_p12 = pnand %p856_p11, %p850_p5 }
 0x15a   : > { %860 = shalt.err (!%p857_p12)
}
 0x15b   : > { %673 = dma.vmem_to_hbm [thread:$0]  (%p1097_p10), %s526_s19, 128, %s1132_s2, [#allocation5]  }
 0x15c   : > { %904 = dma.done.wait (%p1097_p10), [#allocation5], 128  }
 0x15d   : > { %906 = vsyncadd (%p1097_p10), [#allocation5], 4294967168 }
 0x15e PF: > { %s19_s14 = sadd.s32 1, %s929_s14   ;;  %s1138_s9 = smov %s913_s10 }
 0x15f   : > { %p16_p13 = scmp.ge.s32.totalorder %s19_s14, 4   ;;  %s1139_s10 = smov %s917_s11 }
 0x160   : > { %s1140_s11 = smov %s1004_s21  ;;  %s1141_s12 = smov %s925_s13 }
 0x161   : > { %s1142_s13 = smov %s1144_s16  ;;  %18 = sbr.rel (!%p16_p13) target bundleno = 7 (0x7), region = 87 }
 0x166   :  { %538 = vsyncpa [#allocation4], 1 }
 0x167   :  { %540 = vsyncpa [#allocation4 + $0x1], 1 }
 0x168   :  { %541 = vsyncpa [#allocation7], 1 }
 0x169   :  { %543 = vsyncpa [#allocation7 + $0x1], 1 }
 0x16a   :  { %544 = vsyncpa [#allocation5], 1 }
 0x16b   :  { %546 = vsyncpa [#allocation5 + $0x1], 1 }

</bundles_post_ra>
